<compile_context>
chip_gen: v6e
topology: v6e:2x2x1
jax: 0.10.0
libtpu: 0.0.40
codegen_flags: <defaults>
</compile_context>

<pallas_src>
import jax
import jax.numpy as jnp
from jax.experimental import pallas as pl
from jax.experimental.pallas import tpu as pltpu


LANE = 128
SUBLANE = 8
MAX_TILE_B = 512


def _round_up(n, m):
    return ((n + m - 1) // m) * m


# ----------------------------------------------------------------------------
# Fused kernel
# ----------------------------------------------------------------------------
def fused_kernel(x_ref,
                 w1, t1, w2, t2, w3, t3, w4, t4, w5, t5,
                 wo, to, mt,
                 emb_ref, out1_ref, out2_ref):
    """Whole SiameseNet forward for one batch tile (both branches stacked)."""

    def lin(h, w_ref, t_ref, relu):
        # bf16 MXU operands, f32 accumulation; elementwise epilogue stays f32.
        z = jnp.dot(h.astype(w_ref.dtype), w_ref[...],
                    preferred_element_type=jnp.float32)
        z = z + t_ref[...]
        return jnp.maximum(z, 0.0) if relu else z

    h = x_ref[...]
    h = lin(h, w1, t1, True)
    h = lin(h, w2, t2, True)
    h = lin(h, w3, t3, True)
    h = lin(h, w4, t4, True)
    h = lin(h, w5, t5, False)          # last BaseNet layer: Linear + BN, no ReLU
    emb_ref[...] = h

    hr = jnp.maximum(h, 0.0)           # self.relu (dropout == identity in eval)
    z = jnp.dot(hr.astype(wo.dtype), wo[...],
                preferred_element_type=jnp.float32) + to[...]
    out1_ref[...] = z
    prob = jax.nn.sigmoid(z)
    out2_ref[...] = jnp.dot(prob.astype(mt.dtype), mt[...],
                            preferred_element_type=jnp.float32)


# ----------------------------------------------------------------------------
# Parameter construction / offline preparation (BN fold + lane padding + bf16)
# ----------------------------------------------------------------------------
def make_params(key, in_features, num_classes_1, num_classes_2):
    """Deterministic synthetic parameters mirroring the PyTorch module shapes."""
    dims = [in_features,
            int(in_features * 0.8),
            int(in_features * 0.6),
            int(in_features * 0.4),
            int(in_features * 0.2),
            128]
    keys = jax.random.split(key, 64)
    ki = iter(range(64))

    def linear(fin, fout):
        w = jax.random.normal(keys[next(ki)], (fin, fout), jnp.float32) * 0.05
        b = jax.random.normal(keys[next(ki)], (fout,), jnp.float32) * 0.05
        return w, b

    def bn(f):
        gamma = 1.0 + 0.1 * jax.random.normal(keys[next(ki)], (f,), jnp.float32)
        beta = 0.1 * jax.random.normal(keys[next(ki)], (f,), jnp.float32)
        mean = 0.1 * jax.random.normal(keys[next(ki)], (f,), jnp.float32)
        var = 1.0 + 0.1 * jax.random.uniform(keys[next(ki)], (f,), jnp.float32)
        return gamma, beta, mean, var

    base = []
    for i in range(5):
        w, b = linear(dims[i], dims[i + 1])
        g, be, m, v = bn(dims[i + 1])
        base.append((w, b, g, be, m, v))

    w_out, b_out = linear(128, num_classes_1)
    g, be, m, v = bn(num_classes_1)
    head = (w_out, b_out, g, be, m, v)

    # Ontological matrix M: shape (num_classes_2, num_classes_1), fixed 0/1.
    M = (jax.random.uniform(keys[next(ki)],
                            (num_classes_2, num_classes_1), jnp.float32)
         > 0.5).astype(jnp.float32)
    return dict(base=base, head=head, M=M)


def _fold_bn(w, b, gamma, beta, mean, var, eps=1e-5):
    scale = gamma / jnp.sqrt(var + eps)
    w_folded = w * scale[None, :]
    shift = (b - mean) * scale + beta
    return w_folded, shift


def _pad2d(a, rows, cols):
    return jnp.pad(a, ((0, rows - a.shape[0]), (0, cols - a.shape[1])))


def prepare_params(params, weight_dtype=jnp.bfloat16):
    """Fold BN into weights, zero-pad to lane multiples, cast weights to bf16."""
    tensors = []
    for (w, b, g, be, m, v) in params["base"]:
        wf, sh = _fold_bn(w, b, g, be, m, v)
        fin_p = _round_up(wf.shape[0], LANE)
        fout_p = _round_up(wf.shape[1], LANE)
        tensors.append(_pad2d(wf, fin_p, fout_p).astype(weight_dtype))
        tensors.append(_pad2d(sh.reshape(1, -1), 1, fout_p).astype(jnp.float32))

    w, b, g, be, m, v = params["head"]
    wf, sh = _fold_bn(w, b, g, be, m, v)
    c1 = wf.shape[1]
    c1_p = _round_up(c1, LANE)
    tensors.append(_pad2d(wf, _round_up(wf.shape[0], LANE), c1_p)
                   .astype(weight_dtype))
    tensors.append(_pad2d(sh.reshape(1, -1), 1, c1_p).astype(jnp.float32))

    mt = params["M"].T                          # (C1, C2), hoisted transpose
    c2 = mt.shape[1]
    c2_p = _round_up(c2, LANE)
    tensors.append(_pad2d(mt, c1_p, c2_p).astype(weight_dtype))

    meta = dict(in_features=params["base"][0][0].shape[0],
                num_classes_1=c1, num_classes_2=c2)
    return tuple(tensors), meta


# ----------------------------------------------------------------------------
# Forward wrapper (jitted; padded params are closed over as constants)
# ----------------------------------------------------------------------------
def build_forward(tensors, meta):
    F = meta["in_features"]
    C1 = meta["num_classes_1"]
    C2 = meta["num_classes_2"]
    Fp = tensors[0].shape[0]          # padded in_features
    EMB = tensors[8].shape[1]         # padded embedding width (=128)
    C1p = tensors[10].shape[1]
    C2p = tensors[12].shape[1]

    def fwd(x1, x2):
        B = x1.shape[0]
        x = jnp.concatenate([x1, x2], axis=0)          # both branches stacked
        nrows = 2 * B
        tile_b = min(MAX_TILE_B, _round_up(nrows, SUBLANE))
        brows = _round_up(nrows, tile_b)
        x = jnp.pad(x, ((0, brows - nrows), (0, Fp - F)))
        grid = (brows // tile_b,)

        row_map = lambda i: (i, 0)
        const_map = lambda i: (0, 0)

        in_specs = [pl.BlockSpec((tile_b, Fp), row_map)]
        in_specs += [pl.BlockSpec(t.shape, const_map) for t in tensors]

        out_specs = (pl.BlockSpec((tile_b, EMB), row_map),
                     pl.BlockSpec((tile_b, C1p), row_map),
                     pl.BlockSpec((tile_b, C2p), row_map))
        out_shape = (jax.ShapeDtypeStruct((brows, EMB), jnp.float32),
                     jax.ShapeDtypeStruct((brows, C1p), jnp.float32),
                     jax.ShapeDtypeStruct((brows, C2p), jnp.float32))

        emb, out1, out2 = pl.pallas_call(
            fused_kernel,
            out_shape=out_shape,
            grid=grid,
            in_specs=in_specs,
            out_specs=out_specs,
            compiler_params=pltpu.CompilerParams(
                dimension_semantics=("parallel",)),
        )(x, *tensors)

        # Slice logical widths / branches back out.
        e1, e2 = emb[:B], emb[B:2 * B]
        o11, o21 = out1[:B, :C1], out1[B:2 * B, :C1]
        o12, o22 = out2[:B, :C2], out2[B:2 * B, :C2]
        return e1, e2, o11, o12, o21, o22

    return jax.jit(fwd)


# ----------------------------------------------------------------------------
# Reference (plain JAX, same folded bf16 weights) for sanity check
# ----------------------------------------------------------------------------
def reference_forward(x1, x2, params, weight_dtype=jnp.bfloat16):
    def run_base(x):
        h = x
        for i, (w, b, g, be, m, v) in enumerate(params["base"]):
            wf, sh = _fold_bn(w, b, g, be, m, v)
            h = jnp.dot(h.astype(weight_dtype), wf.astype(weight_dtype),
                        preferred_element_type=jnp.float32) + sh
            if i < 4:
                h = jnp.maximum(h, 0.0)
        return h

    def run_head(emb):
        w, b, g, be, m, v = params["head"]
        wf, sh = _fold_bn(w, b, g, be, m, v)
        hr = jnp.maximum(emb, 0.0)
        z = jnp.dot(hr.astype(weight_dtype), wf.astype(weight_dtype),
                    preferred_element_type=jnp.float32) + sh
        prob = jax.nn.sigmoid(z)
        mt = params["M"].T.astype(weight_dtype)
        o2 = jnp.dot(prob.astype(weight_dtype), mt,
                     preferred_element_type=jnp.float32)
        return z, o2

    e1, e2 = run_base(x1), run_base(x2)
    o11, o12 = run_head(e1)
    o21, o22 = run_head(e2)
    return e1, e2, o11, o12, o21, o22


# ----------------------------------------------------------------------------
if __name__ == "__main__":
    B = 4
    in_features = 64          # -> 51 -> 38 -> 25 -> 12 -> 128
    num_classes_1 = 10
    num_classes_2 = 6

    key = jax.random.PRNGKey(0)
    kp, kx1, kx2 = jax.random.split(key, 3)
    params = make_params(kp, in_features, num_classes_1, num_classes_2)
    x1 = jax.random.normal(kx1, (B, in_features), jnp.float32)
    x2 = jax.random.normal(kx2, (B, in_features), jnp.float32)

    tensors, meta = prepare_params(params)
    forward = build_forward(tensors, meta)

    outs = jax.block_until_ready(forward(x1, x2))
    refs = reference_forward(x1, x2, params)

    names = ["embedding1", "embedding2", "out1_1", "out1_2", "out2_1", "out2_2"]
    for name, o, r in zip(names, outs, refs):
        assert o.shape == r.shape, (name, o.shape, r.shape)
        err = float(jnp.max(jnp.abs(o - r)))
        assert err < 1e-3, (name, err)

    print("KERNEL_OK")
</pallas_src>

<mosaic_0001>
module attributes {stable_mosaic.version = 11 : i64} {
  func.func @fused_kernel(%arg0: i32, %arg1: memref<8x128xf32, #tpu.memory_space<vmem>>, %arg2: memref<128x128xbf16, #tpu.memory_space<vmem>>, %arg3: memref<1x128xf32, #tpu.memory_space<vmem>>, %arg4: memref<128x128xbf16, #tpu.memory_space<vmem>>, %arg5: memref<1x128xf32, #tpu.memory_space<vmem>>, %arg6: memref<128x128xbf16, #tpu.memory_space<vmem>>, %arg7: memref<1x128xf32, #tpu.memory_space<vmem>>, %arg8: memref<128x128xbf16, #tpu.memory_space<vmem>>, %arg9: memref<1x128xf32, #tpu.memory_space<vmem>>, %arg10: memref<128x128xbf16, #tpu.memory_space<vmem>>, %arg11: memref<1x128xf32, #tpu.memory_space<vmem>>, %arg12: memref<128x128xbf16, #tpu.memory_space<vmem>>, %arg13: memref<1x128xf32, #tpu.memory_space<vmem>>, %arg14: memref<128x128xbf16, #tpu.memory_space<vmem>>, %arg15: memref<8x128xf32, #tpu.memory_space<vmem>>, %arg16: memref<8x128xf32, #tpu.memory_space<vmem>>, %arg17: memref<8x128xf32, #tpu.memory_space<vmem>>) attributes {dimension_semantics = [#tpu.dimension_semantics<parallel>], iteration_bounds = array<i64: 1>, scalar_prefetch = 0 : i64, scratch_operands = 0 : i64, tpu.core_type = #tpu.core_type<tc>, window_params = [{transform_indices = @transform_0, window_bounds = array<i64: 8, 128>}, {pipeline_mode = #tpu.pipeline_mode<synchronous>, transform_indices = @transform_1, window_bounds = array<i64: 128, 128>}, {pipeline_mode = #tpu.pipeline_mode<synchronous>, transform_indices = @transform_2, window_bounds = array<i64: 1, 128>}, {pipeline_mode = #tpu.pipeline_mode<synchronous>, transform_indices = @transform_3, window_bounds = array<i64: 128, 128>}, {pipeline_mode = #tpu.pipeline_mode<synchronous>, transform_indices = @transform_4, window_bounds = array<i64: 1, 128>}, {pipeline_mode = #tpu.pipeline_mode<synchronous>, transform_indices = @transform_5, window_bounds = array<i64: 128, 128>}, {pipeline_mode = #tpu.pipeline_mode<synchronous>, transform_indices = @transform_6, window_bounds = array<i64: 1, 128>}, {pipeline_mode = #tpu.pipeline_mode<synchronous>, transform_indices = @transform_7, window_bounds = array<i64: 128, 128>}, {pipeline_mode = #tpu.pipeline_mode<synchronous>, transform_indices = @transform_8, window_bounds = array<i64: 1, 128>}, {pipeline_mode = #tpu.pipeline_mode<synchronous>, transform_indices = @transform_9, window_bounds = array<i64: 128, 128>}, {pipeline_mode = #tpu.pipeline_mode<synchronous>, transform_indices = @transform_10, window_bounds = array<i64: 1, 128>}, {pipeline_mode = #tpu.pipeline_mode<synchronous>, transform_indices = @transform_11, window_bounds = array<i64: 128, 128>}, {pipeline_mode = #tpu.pipeline_mode<synchronous>, transform_indices = @transform_12, window_bounds = array<i64: 1, 128>}, {pipeline_mode = #tpu.pipeline_mode<synchronous>, transform_indices = @transform_13, window_bounds = array<i64: 128, 128>}, {transform_indices = @transform_14, window_bounds = array<i64: 8, 128>}, {transform_indices = @transform_15, window_bounds = array<i64: 8, 128>}, {transform_indices = @transform_16, window_bounds = array<i64: 8, 128>}]} {
    %c0 = arith.constant 0 : index
    %c0_0 = arith.constant 0 : index
    %0 = vector.load %arg1[%c0, %c0_0] : memref<8x128xf32, #tpu.memory_space<vmem>>, vector<8x128xf32>
    %1 = arith.truncf %0 : vector<8x128xf32> to vector<8x128xbf16>
    %c0_1 = arith.constant 0 : index
    %c0_2 = arith.constant 0 : index
    %2 = vector.load %arg2[%c0_1, %c0_2] : memref<128x128xbf16, #tpu.memory_space<vmem>>, vector<128x128xbf16>
    %cst = arith.constant dense<0.000000e+00> : vector<8x128xf32>
    %3 = tpu.matmul %1, %2, %cst {dimension_numbers = #tpu.dot_dimension_numbers<[1], [0], [0], [1], [0, 0, 1, 1], [], []>} : vector<8x128xbf16>, vector<128x128xbf16>, vector<8x128xf32> -> vector<8x128xf32>
    %c0_3 = arith.constant 0 : index
    %c0_4 = arith.constant 0 : index
    %4 = vector.load %arg3[%c0_3, %c0_4] : memref<1x128xf32, #tpu.memory_space<vmem>>, vector<1x128xf32>
    %5 = vector.broadcast %4 : vector<1x128xf32> to vector<8x128xf32>
    %6 = arith.addf %3, %5 : vector<8x128xf32>
    %cst_5 = arith.constant 0.000000e+00 : f32
    %7 = vector.broadcast %cst_5 : f32 to vector<8x128xf32>
    %8 = arith.maximumf %6, %7 : vector<8x128xf32>
    %9 = arith.truncf %8 : vector<8x128xf32> to vector<8x128xbf16>
    %c0_6 = arith.constant 0 : index
    %c0_7 = arith.constant 0 : index
    %10 = vector.load %arg4[%c0_6, %c0_7] : memref<128x128xbf16, #tpu.memory_space<vmem>>, vector<128x128xbf16>
    %cst_8 = arith.constant dense<0.000000e+00> : vector<8x128xf32>
    %11 = tpu.matmul %9, %10, %cst_8 {dimension_numbers = #tpu.dot_dimension_numbers<[1], [0], [0], [1], [0, 0, 1, 1], [], []>} : vector<8x128xbf16>, vector<128x128xbf16>, vector<8x128xf32> -> vector<8x128xf32>
    %c0_9 = arith.constant 0 : index
    %c0_10 = arith.constant 0 : index
    %12 = vector.load %arg5[%c0_9, %c0_10] : memref<1x128xf32, #tpu.memory_space<vmem>>, vector<1x128xf32>
    %13 = vector.broadcast %12 : vector<1x128xf32> to vector<8x128xf32>
    %14 = arith.addf %11, %13 : vector<8x128xf32>
    %cst_11 = arith.constant 0.000000e+00 : f32
    %15 = vector.broadcast %cst_11 : f32 to vector<8x128xf32>
    %16 = arith.maximumf %14, %15 : vector<8x128xf32>
    %17 = arith.truncf %16 : vector<8x128xf32> to vector<8x128xbf16>
    %c0_12 = arith.constant 0 : index
    %c0_13 = arith.constant 0 : index
    %18 = vector.load %arg6[%c0_12, %c0_13] : memref<128x128xbf16, #tpu.memory_space<vmem>>, vector<128x128xbf16>
    %cst_14 = arith.constant dense<0.000000e+00> : vector<8x128xf32>
    %19 = tpu.matmul %17, %18, %cst_14 {dimension_numbers = #tpu.dot_dimension_numbers<[1], [0], [0], [1], [0, 0, 1, 1], [], []>} : vector<8x128xbf16>, vector<128x128xbf16>, vector<8x128xf32> -> vector<8x128xf32>
    %c0_15 = arith.constant 0 : index
    %c0_16 = arith.constant 0 : index
    %20 = vector.load %arg7[%c0_15, %c0_16] : memref<1x128xf32, #tpu.memory_space<vmem>>, vector<1x128xf32>
    %21 = vector.broadcast %20 : vector<1x128xf32> to vector<8x128xf32>
    %22 = arith.addf %19, %21 : vector<8x128xf32>
    %cst_17 = arith.constant 0.000000e+00 : f32
    %23 = vector.broadcast %cst_17 : f32 to vector<8x128xf32>
    %24 = arith.maximumf %22, %23 : vector<8x128xf32>
    %25 = arith.truncf %24 : vector<8x128xf32> to vector<8x128xbf16>
    %c0_18 = arith.constant 0 : index
    %c0_19 = arith.constant 0 : index
    %26 = vector.load %arg8[%c0_18, %c0_19] : memref<128x128xbf16, #tpu.memory_space<vmem>>, vector<128x128xbf16>
    %cst_20 = arith.constant dense<0.000000e+00> : vector<8x128xf32>
    %27 = tpu.matmul %25, %26, %cst_20 {dimension_numbers = #tpu.dot_dimension_numbers<[1], [0], [0], [1], [0, 0, 1, 1], [], []>} : vector<8x128xbf16>, vector<128x128xbf16>, vector<8x128xf32> -> vector<8x128xf32>
    %c0_21 = arith.constant 0 : index
    %c0_22 = arith.constant 0 : index
    %28 = vector.load %arg9[%c0_21, %c0_22] : memref<1x128xf32, #tpu.memory_space<vmem>>, vector<1x128xf32>
    %29 = vector.broadcast %28 : vector<1x128xf32> to vector<8x128xf32>
    %30 = arith.addf %27, %29 : vector<8x128xf32>
    %cst_23 = arith.constant 0.000000e+00 : f32
    %31 = vector.broadcast %cst_23 : f32 to vector<8x128xf32>
    %32 = arith.maximumf %30, %31 : vector<8x128xf32>
    %33 = arith.truncf %32 : vector<8x128xf32> to vector<8x128xbf16>
    %c0_24 = arith.constant 0 : index
    %c0_25 = arith.constant 0 : index
    %34 = vector.load %arg10[%c0_24, %c0_25] : memref<128x128xbf16, #tpu.memory_space<vmem>>, vector<128x128xbf16>
    %cst_26 = arith.constant dense<0.000000e+00> : vector<8x128xf32>
    %35 = tpu.matmul %33, %34, %cst_26 {dimension_numbers = #tpu.dot_dimension_numbers<[1], [0], [0], [1], [0, 0, 1, 1], [], []>} : vector<8x128xbf16>, vector<128x128xbf16>, vector<8x128xf32> -> vector<8x128xf32>
    %c0_27 = arith.constant 0 : index
    %c0_28 = arith.constant 0 : index
    %36 = vector.load %arg11[%c0_27, %c0_28] : memref<1x128xf32, #tpu.memory_space<vmem>>, vector<1x128xf32>
    %37 = vector.broadcast %36 : vector<1x128xf32> to vector<8x128xf32>
    %38 = arith.addf %35, %37 : vector<8x128xf32>
    %c0_29 = arith.constant 0 : index
    %c0_30 = arith.constant 0 : index
    %39 = vector.load %arg15[%c0_29, %c0_30] : memref<8x128xf32, #tpu.memory_space<vmem>>, vector<8x128xf32>
    tpu.vector_store %arg15[%c0_29, %c0_30], %38 {strides = array<i32>} : memref<8x128xf32, #tpu.memory_space<vmem>>, vector<8x128xf32>,
    %cst_31 = arith.constant 0.000000e+00 : f32
    %40 = vector.broadcast %cst_31 : f32 to vector<8x128xf32>
    %41 = arith.maximumf %38, %40 : vector<8x128xf32>
    %42 = arith.truncf %41 : vector<8x128xf32> to vector<8x128xbf16>
    %c0_32 = arith.constant 0 : index
    %c0_33 = arith.constant 0 : index
    %43 = vector.load %arg12[%c0_32, %c0_33] : memref<128x128xbf16, #tpu.memory_space<vmem>>, vector<128x128xbf16>
    %cst_34 = arith.constant dense<0.000000e+00> : vector<8x128xf32>
    %44 = tpu.matmul %42, %43, %cst_34 {dimension_numbers = #tpu.dot_dimension_numbers<[1], [0], [0], [1], [0, 0, 1, 1], [], []>} : vector<8x128xbf16>, vector<128x128xbf16>, vector<8x128xf32> -> vector<8x128xf32>
    %c0_35 = arith.constant 0 : index
    %c0_36 = arith.constant 0 : index
    %45 = vector.load %arg13[%c0_35, %c0_36] : memref<1x128xf32, #tpu.memory_space<vmem>>, vector<1x128xf32>
    %46 = vector.broadcast %45 : vector<1x128xf32> to vector<8x128xf32>
    %47 = arith.addf %44, %46 : vector<8x128xf32>
    %c0_37 = arith.constant 0 : index
    %c0_38 = arith.constant 0 : index
    %48 = vector.load %arg16[%c0_37, %c0_38] : memref<8x128xf32, #tpu.memory_space<vmem>>, vector<8x128xf32>
    tpu.vector_store %arg16[%c0_37, %c0_38], %47 {strides = array<i32>} : memref<8x128xf32, #tpu.memory_space<vmem>>, vector<8x128xf32>,
    %49 = arith.negf %47 : vector<8x128xf32>
    %50 = math.exp %49 : vector<8x128xf32>
    %cst_39 = arith.constant 1.000000e+00 : f32
    %51 = vector.broadcast %cst_39 : f32 to vector<8x128xf32>
    %52 = arith.addf %51, %50 : vector<8x128xf32>
    %53 = arith.divf %51, %52 : vector<8x128xf32>
    %54 = arith.truncf %53 : vector<8x128xf32> to vector<8x128xbf16>
    %c0_40 = arith.constant 0 : index
    %c0_41 = arith.constant 0 : index
    %55 = vector.load %arg14[%c0_40, %c0_41] : memref<128x128xbf16, #tpu.memory_space<vmem>>, vector<128x128xbf16>
    %cst_42 = arith.constant dense<0.000000e+00> : vector<8x128xf32>
    %56 = tpu.matmul %54, %55, %cst_42 {dimension_numbers = #tpu.dot_dimension_numbers<[1], [0], [0], [1], [0, 0, 1, 1], [], []>} : vector<8x128xbf16>, vector<128x128xbf16>, vector<8x128xf32> -> vector<8x128xf32>
    %c0_43 = arith.constant 0 : index
    %c0_44 = arith.constant 0 : index
    %57 = vector.load %arg17[%c0_43, %c0_44] : memref<8x128xf32, #tpu.memory_space<vmem>>, vector<8x128xf32>
    tpu.vector_store %arg17[%c0_43, %c0_44], %56 {strides = array<i32>} : memref<8x128xf32, #tpu.memory_space<vmem>>, vector<8x128xf32>,
    return
  }
  func.func @transform_0(%arg0: i32) -> (i32, i32) {
    %c0_i32 = arith.constant 0 : i32
    %c0_i32_0 = arith.constant 0 : i32
    return %arg0, %c0_i32 : i32, i32
  }
  func.func @transform_1(%arg0: i32) -> (i32, i32) {
    %c0_i32 = arith.constant 0 : i32
    %c0_i32_0 = arith.constant 0 : i32
    %c0_i32_1 = arith.constant 0 : i32
    return %c0_i32, %c0_i32_0 : i32, i32
  }
  func.func @transform_2(%arg0: i32) -> (i32, i32) {
    %c0_i32 = arith.constant 0 : i32
    %c0_i32_0 = arith.constant 0 : i32
    %c0_i32_1 = arith.constant 0 : i32
    return %c0_i32, %c0_i32_0 : i32, i32
  }
  func.func @transform_3(%arg0: i32) -> (i32, i32) {
    %c0_i32 = arith.constant 0 : i32
    %c0_i32_0 = arith.constant 0 : i32
    %c0_i32_1 = arith.constant 0 : i32
    return %c0_i32, %c0_i32_0 : i32, i32
  }
  func.func @transform_4(%arg0: i32) -> (i32, i32) {
    %c0_i32 = arith.constant 0 : i32
    %c0_i32_0 = arith.constant 0 : i32
    %c0_i32_1 = arith.constant 0 : i32
    return %c0_i32, %c0_i32_0 : i32, i32
  }
  func.func @transform_5(%arg0: i32) -> (i32, i32) {
    %c0_i32 = arith.constant 0 : i32
    %c0_i32_0 = arith.constant 0 : i32
    %c0_i32_1 = arith.constant 0 : i32
    return %c0_i32, %c0_i32_0 : i32, i32
  }
  func.func @transform_6(%arg0: i32) -> (i32, i32) {
    %c0_i32 = arith.constant 0 : i32
    %c0_i32_0 = arith.constant 0 : i32
    %c0_i32_1 = arith.constant 0 : i32
    return %c0_i32, %c0_i32_0 : i32, i32
  }
  func.func @transform_7(%arg0: i32) -> (i32, i32) {
    %c0_i32 = arith.constant 0 : i32
    %c0_i32_0 = arith.constant 0 : i32
    %c0_i32_1 = arith.constant 0 : i32
    return %c0_i32, %c0_i32_0 : i32, i32
  }
  func.func @transform_8(%arg0: i32) -> (i32, i32) {
    %c0_i32 = arith.constant 0 : i32
    %c0_i32_0 = arith.constant 0 : i32
    %c0_i32_1 = arith.constant 0 : i32
    return %c0_i32, %c0_i32_0 : i32, i32
  }
  func.func @transform_9(%arg0: i32) -> (i32, i32) {
    %c0_i32 = arith.constant 0 : i32
    %c0_i32_0 = arith.constant 0 : i32
    %c0_i32_1 = arith.constant 0 : i32
    return %c0_i32, %c0_i32_0 : i32, i32
  }
  func.func @transform_10(%arg0: i32) -> (i32, i32) {
    %c0_i32 = arith.constant 0 : i32
    %c0_i32_0 = arith.constant 0 : i32
    %c0_i32_1 = arith.constant 0 : i32
    return %c0_i32, %c0_i32_0 : i32, i32
  }
  func.func @transform_11(%arg0: i32) -> (i32, i32) {
    %c0_i32 = arith.constant 0 : i32
    %c0_i32_0 = arith.constant 0 : i32
    %c0_i32_1 = arith.constant 0 : i32
    return %c0_i32, %c0_i32_0 : i32, i32
  }
  func.func @transform_12(%arg0: i32) -> (i32, i32) {
    %c0_i32 = arith.constant 0 : i32
    %c0_i32_0 = arith.constant 0 : i32
    %c0_i32_1 = arith.constant 0 : i32
    return %c0_i32, %c0_i32_0 : i32, i32
  }
  func.func @transform_13(%arg0: i32) -> (i32, i32) {
    %c0_i32 = arith.constant 0 : i32
    %c0_i32_0 = arith.constant 0 : i32
    %c0_i32_1 = arith.constant 0 : i32
    return %c0_i32, %c0_i32_0 : i32, i32
  }
  func.func @transform_14(%arg0: i32) -> (i32, i32) {
    %c0_i32 = arith.constant 0 : i32
    %c0_i32_0 = arith.constant 0 : i32
    return %arg0, %c0_i32 : i32, i32
  }
  func.func @transform_15(%arg0: i32) -> (i32, i32) {
    %c0_i32 = arith.constant 0 : i32
    %c0_i32_0 = arith.constant 0 : i32
    return %arg0, %c0_i32 : i32, i32
  }
  func.func @transform_16(%arg0: i32) -> (i32, i32) {
    %c0_i32 = arith.constant 0 : i32
    %c0_i32_0 = arith.constant 0 : i32
    return %arg0, %c0_i32 : i32, i32
  }
}

</mosaic_0001>

<bundles_post_ra>
// kernel: fwd.1
= control target key start
LH: loop header
LB: loop body
LE: loop exit
PB: predicated region body
PF: predicated region fallthrough
CT: control target
= control target key end

     0   :  { %s1677_s0 = inlined_call_operand.vmem [shape: f32[8,128], index: 0, kind: input, shape index: {}]   ;;  %s1678_s1 = inlined_call_operand.hbm [shape: bf16[128,128], index: 1, kind: input, shape index: {}]   ;;  %s1679_s2 = inlined_call_operand.vmem [shape: f32[1,128], index: 2, kind: input, shape index: {}]   ;;  %s1680_s3 = inlined_call_operand.hbm [shape: bf16[128,128], index: 3, kind: input, shape index: {}]   ;;  %s1681_s4 = inlined_call_operand.vmem [shape: f32[1,128], index: 4, kind: input, shape index: {}]   ;;  %s1682_s5 = inlined_call_operand.hbm [shape: bf16[128,128], index: 5, kind: input, shape index: {}]   ;;  %s1683_s6 = inlined_call_operand.vmem [shape: f32[1,128], index: 6, kind: input, shape index: {}]   ;;  %s1684_s7 = inlined_call_operand.hbm [shape: bf16[128,128], index: 7, kind: input, shape index: {}]   ;;  %s1685_s8 = inlined_call_operand.vmem [shape: f32[1,128], index: 8, kind: input, shape index: {}]   ;;  %s1686_s9 = inlined_call_operand.hbm [shape: bf16[128,128], index: 9, kind: input, shape index: {}]   ;;  %s1687_s10 = inlined_call_operand.vmem [shape: f32[1,128], index: 10, kind: input, shape index: {}]   ;;  %s1688_s11 = inlined_call_operand.hbm [shape: bf16[128,128], index: 11, kind: input, shape index: {}]   ;;  %s1689_s12 = inlined_call_operand.vmem [shape: f32[1,128], index: 12, kind: input, shape index: {}]   ;;  %s1690_s13 = inlined_call_operand.hbm [shape: bf16[128,128], index: 13, kind: input, shape index: {}]   ;;  %s1691_s14 = inlined_call_operand.vmem [shape: f32[8,128], index: 14, kind: output, shape index: {0}]   ;;  %s1692_s15 = inlined_call_operand.vmem [shape: f32[8,128], index: 15, kind: output, shape index: {1}]   ;;  %s1693_s16 = inlined_call_operand.vmem [shape: f32[8,128], index: 16, kind: output, shape index: {2}]  }
   0x1   :  { %1694 = sst [smem:[#allocation17_spill]] %s1677_s0 }
   0x2   :  { %22 = vsyncpa [#allocation3], 0 }
   0x3   :  { %23 = vsyncpa [#allocation5], 0 }
   0x4   :  { %24 = vsyncpa [#allocation8], 0 }
   0x5   :  { %25 = vsyncpa [#allocation11], 0  ;;  %s1439_s21 = smov [#allocation4]   ;;  %s1440_s23 = smov [#allocation7]  }
   0x6   :  { %s47_s22 = sshll.u32 %s1439_s21, 4  ;;  %s75_s24 = sshll.u32 %s1440_s23, 4  ;;  %s48_s22 = int_to_ptr.vmem [resolvable:$true] %s47_s22  ;;  %s76_s24 = int_to_ptr.vmem [resolvable:$true] %s75_s24 }
   0x7   :  { %s1299_s25 = scalar_lea.vmem %s48_s22, 1024  ;;  %p1304_p1 = scmp.lt.s32.totalorder %s48_s22, %s48_s22 }
   0x8   :  { %p1300_p0 = scmp.ne.s32.totalorder %s48_s22, %s1299_s25  ;;  %p1305_p2 = scmp.lt.s32.totalorder %s1299_s25, %s1299_s25 }
   0xa   :  { %p1306_p3 = por %p1305_p2, %p1304_p1 }
   0xc   :  { %p1307_p4 = pnand %p1306_p3, %p1300_p0 }
   0xe   :  { %1310 = shalt.err (!%p1307_p4)
}
   0xf   :  { %s1441_s26 = smov 64   ;;  %s1442_s27 = smov 4  }
  0x10   :  { %53 = dma.hbm_to_vmem [thread:$0]  %s1680_s3, 1024, %s48_s22, [#allocation5], %s1441_s26, %s1441_s26, %s1442_s27  }
  0x11   :  { %s1319_s30 = scalar_lea.vmem %s76_s24, 1024  ;;  %p1324_p6 = scmp.lt.s32.totalorder %s76_s24, %s76_s24 }
  0x12   :  { %p1320_p5 = scmp.ne.s32.totalorder %s76_s24, %s1319_s30  ;;  %p1325_p7 = scmp.lt.s32.totalorder %s1319_s30, %s1319_s30 }
  0x14   :  { %p1326_p8 = por %p1325_p7, %p1324_p6 }
  0x16   :  { %p1327_p9 = pnand %p1326_p8, %p1320_p5 }
  0x18   :  { %1330 = shalt.err (!%p1327_p9)
}
  0x19   :  { %81 = dma.hbm_to_vmem [thread:$0]  %s1684_s7, 1024, %s76_s24, [#allocation8], %s1441_s26, %s1441_s26, %s1442_s27  }
  0x1a   :  { %s1443_s18 = smov [#allocation10]   ;;  %s1444_s20 = smov [#allocation2]  }
  0x1b   :  { %s103_s19 = sshll.u32 %s1443_s18, 4  ;;  %s33_s21 = sshll.u32 %s1444_s20, 4  ;;  %s104_s19 = int_to_ptr.vmem [resolvable:$true] %s103_s19  ;;  %s34_s21 = int_to_ptr.vmem [resolvable:$true] %s33_s21 }
  0x1c   :  { %s1339_s3 = scalar_lea.vmem %s104_s19, 1024  ;;  %p1344_p11 = scmp.lt.s32.totalorder %s104_s19, %s104_s19 }
  0x1d   :  { %p1340_p10 = scmp.ne.s32.totalorder %s104_s19, %s1339_s3  ;;  %p1345_p12 = scmp.lt.s32.totalorder %s1339_s3, %s1339_s3 }
  0x1f   :  { %p1346_p13 = por %p1345_p12, %p1344_p11 }
  0x21   :  { %p1347_p0 = pnand %p1346_p13, %p1340_p10 }
  0x23   :  { %1350 = shalt.err (!%p1347_p0)
}
  0x24   :  { %109 = dma.hbm_to_vmem [thread:$0]  %s1688_s11, 1024, %s104_s19, [#allocation11], %s1441_s26, %s1441_s26, %s1442_s27  }
  0x25   :  { %s1359_s7 = scalar_lea.vmem %s34_s21, 1024  ;;  %p1364_p2 = scmp.lt.s32.totalorder %s34_s21, %s34_s21 }
  0x26   :  { %p1360_p1 = scmp.ne.s32.totalorder %s34_s21, %s1359_s7  ;;  %p1365_p3 = scmp.lt.s32.totalorder %s1359_s7, %s1359_s7 }
  0x28   :  { %p1366_p4 = por %p1365_p3, %p1364_p2 }
  0x2a   :  { %p1367_p5 = pnand %p1366_p4, %p1360_p1 }
  0x2c   :  { %1370 = shalt.err (!%p1367_p5)
}
  0x2d   :  { %39 = dma.hbm_to_vmem [thread:$0]  %s1678_s1, 1024, %s34_s21, [#allocation3], %s1441_s26, %s1441_s26, %s1442_s27  }
  0x2e   :  { %s1445_s28 = smov [#allocation6]   ;;  %s1446_s30 = smov [#allocation9]  }
  0x2f   :  { %s61_s29 = sshll.u32 %s1445_s28, 4  ;;  %s89_s0 = sshll.u32 %s1446_s30, 4  ;;  %s62_s29 = int_to_ptr.vmem [resolvable:$true] %s61_s29  ;;  %s90_s0 = int_to_ptr.vmem [resolvable:$true] %s89_s0 }
  0x30   :  { %s1379_s11 = scalar_lea.vmem %s62_s29, 1024  ;;  %p1384_p7 = scmp.lt.s32.totalorder %s62_s29, %s62_s29 }
  0x31   :  { %p1380_p6 = scmp.ne.s32.totalorder %s62_s29, %s1379_s11  ;;  %p1385_p8 = scmp.lt.s32.totalorder %s1379_s11, %s1379_s11 }
  0x33   :  { %p1386_p9 = por %p1385_p8, %p1384_p7 }
  0x35   :  { %p1387_p10 = pnand %p1386_p9, %p1380_p6 }
  0x37   :  { %1390 = shalt.err (!%p1387_p10)
}
  0x38   :  { %67 = dma.hbm_to_vmem [thread:$0]  %s1682_s5, 1024, %s62_s29, [#allocation5], %s1441_s26, %s1441_s26, %s1442_s27  }
  0x39   :  { %s1399_s1 = scalar_lea.vmem %s90_s0, 1024  ;;  %p1404_p12 = scmp.lt.s32.totalorder %s90_s0, %s90_s0 }
  0x3a   :  { %p1400_p11 = scmp.ne.s32.totalorder %s90_s0, %s1399_s1  ;;  %p1405_p13 = scmp.lt.s32.totalorder %s1399_s1, %s1399_s1 }
  0x3c   :  { %p1406_p0 = por %p1405_p13, %p1404_p12 }
  0x3e   :  { %p1407_p1 = pnand %p1406_p0, %p1400_p11 }
  0x40   :  { %1410 = shalt.err (!%p1407_p1)
}
  0x41   :  { %95 = dma.hbm_to_vmem [thread:$0]  %s1686_s9, 1024, %s90_s0, [#allocation8], %s1441_s26, %s1441_s26, %s1442_s27  }
  0x42   :  { %s1447_s21 = smov [#allocation12]  }
  0x43   :  { %s117_s3 = sshll.u32 %s1447_s21, 4  ;;  %s118_s3 = int_to_ptr.vmem [resolvable:$true] %s117_s3 }
  0x44   :  { %s1419_s22 = scalar_lea.vmem %s118_s3, 1024  ;;  %p1424_p3 = scmp.lt.s32.totalorder %s118_s3, %s118_s3 }
  0x45   :  { %p1420_p2 = scmp.ne.s32.totalorder %s118_s3, %s1419_s22  ;;  %p1425_p4 = scmp.lt.s32.totalorder %s1419_s22, %s1419_s22 }
  0x47   :  { %p1426_p5 = por %p1425_p4, %p1424_p3 }
  0x49   :  { %p1427_p6 = pnand %p1426_p5, %p1420_p2 }
  0x4b   :  { %1430 = shalt.err (!%p1427_p6)
}
  0x4c   :  { %123 = dma.hbm_to_vmem [thread:$0]  %s1690_s13, 1024, %s118_s3, [#allocation11], %s1441_s26, %s1441_s26, %s1442_s27  }
  0x4d   :  { %1431 = dma.done.wait [#allocation3], 1024  }
  0x4e   :  { %1432 = vsyncadd [#allocation3], 4294966272 }
  0x4f   :  { %1433 = dma.done.wait [#allocation5], 2048  }
  0x50   :  { %1434 = vsyncadd [#allocation5], 4294965248 }
  0x51   :  { %1435 = dma.done.wait [#allocation8], 2048  }
  0x52   :  { %1436 = vsyncadd [#allocation8], 4294965248 }
  0x53   :  { %1437 = dma.done.wait [#allocation11], 2048  }
  0x54   :  { %1438 = vsyncadd [#allocation11], 4294965248  ;;  %v1448_v0 = vmov 0.0   ;;  %vm1449_vm0 = vmmov 0   ;;  %v1231_v1 = vld [vmem:[#allocation2 + $0x38] sm:$0xff]   ;;  %v1232_v2 = vld [vmem:[#allocation2 + $0x30] sm:$0xff]  }
  0x55   :  { %1080 = vmatprep.subr.bf16.mxu0 %v1448_v0  ;;  %1096 = vmatprep.mubr.msk.bf16.mxu0 %vm1449_vm0, %v1448_v0  ;;  %v1233_v3 = vld [vmem:[#allocation2 + $0x28] sm:$0xff]   ;;  %v1239_v4 = vld [vmem:[#allocation4 + $0x38] sm:$0xff]   ;;  %v1234_v5 = vld [vmem:[#allocation2 + $0x20] sm:$0xff]   ;;  %s1695_s26 = sld [smem:[#allocation17_spill]] }
  0x56   :  { %1100 = vmatprep.subr.bf16.mxu1 %v1448_v0  ;;  %1116 = vmatprep.mubr.msk.bf16.mxu1 %vm1449_vm0, %v1448_v0  ;;  %v1240_v6 = vld [vmem:[#allocation4 + $0x30] sm:$0xff]   ;;  %v1235_v7 = vld [vmem:[#allocation2 + $0x18] sm:$0xff]   ;;  %v1241_v8 = vld [vmem:[#allocation4 + $0x28] sm:$0xff]  }
  0x57   :  { %1081 = vmatpush3.bf16.msra.mxu0 %v1231_v1  ;;  %1101 = vmatpush3.bf16.msra.mxu1 %v1239_v4  ;;  %v1236_v9 = vld [vmem:[#allocation2 + $0x10] sm:$0xff]   ;;  %v1242_v10 = vld [vmem:[#allocation4 + $0x20] sm:$0xff]   ;;  %v1237_v11 = vld [vmem:[#allocation2 + $0x8] sm:$0xff]  }
  0x58   :  { %1082 = vmatprep.subr.bf16.mxu0 %v1448_v0  ;;  %1102 = vmatprep.subr.bf16.mxu1 %v1448_v0  ;;  %v1243_v12 = vld [vmem:[#allocation4 + $0x18] sm:$0xff]   ;;  %v1238_v13 = vld [vmem:[#allocation2] sm:$0xff]   ;;  %v1244_v15 = vld [vmem:[#allocation4 + $0x10] sm:$0xff]  }
  0x59   :  { %v1245_v17 = vld [vmem:[#allocation4 + $0x8] sm:$0xff]   ;;  %v1246_v18 = vld [vmem:[#allocation4] sm:$0xff]   ;;  %v1247_v19 = vld [vmem:[#allocation6 + $0x38] sm:$0xff]  }
  0x5a   :  { %v1248_v20 = vld [vmem:[#allocation6 + $0x30] sm:$0xff]   ;;  %v1249_v21 = vld [vmem:[#allocation6 + $0x28] sm:$0xff]   ;;  %v1250_v22 = vld [vmem:[#allocation6 + $0x20] sm:$0xff]  }
  0x5b   :  { %1083 = vmatpush3.bf16.msra.mxu0 %v1232_v2  ;;  %1103 = vmatpush3.bf16.msra.mxu1 %v1240_v6  ;;  %v146_v14 = vld [vmem:[%s1695_s26] sm:$0xff]  ;;  %v1251_v23 = vld [vmem:[#allocation6 + $0x18] sm:$0xff]   ;;  %v1252_v24 = vld [vmem:[#allocation6 + $0x10] sm:$0xff]  }
  0x5c   :  { %1084 = vmatprep.subr.bf16.mxu0 %v1448_v0  ;;  %1104 = vmatprep.subr.bf16.mxu1 %v1448_v0  ;;  %v147_v16 = vpack.c.bf16 %v146_v14, %v146_v14  ;;  %v954_v25 = vld [vmem:[%s1679_s2] ss:$0 sm:$0xff]  ;;  %v1253_v33 = vld [vmem:[#allocation6 + $0x8] sm:$0xff]   ;;  %v1255_v35 = vld [vmem:[#allocation7 + $0x38] sm:$0xff]  }
  0x5d   :  { %v1254_v34 = vld [vmem:[#allocation6] sm:$0xff]   ;;  %v1256_v36 = vld [vmem:[#allocation7 + $0x30] sm:$0xff]   ;;  %v1257_v37 = vld [vmem:[#allocation7 + $0x28] sm:$0xff]  }
  0x5e   :  { %v1258_v38 = vld [vmem:[#allocation7 + $0x20] sm:$0xff]   ;;  %v1259_v39 = vld [vmem:[#allocation7 + $0x18] sm:$0xff]   ;;  %v1260_v40 = vld [vmem:[#allocation7 + $0x10] sm:$0xff]  }
  0x5f   :  { %1085 = vmatpush3.bf16.msra.mxu0 %v1233_v3  ;;  %1105 = vmatpush3.bf16.msra.mxu1 %v1241_v8  ;;  %v963_v41 = vld [vmem:[%s1681_s4] ss:$0 sm:$0xff]  ;;  %v1261_v49 = vld [vmem:[#allocation7 + $0x8] sm:$0xff]   ;;  %v1263_v51 = vld [vmem:[#allocation9 + $0x38] sm:$0xff]  }
  0x60   :  { %1086 = vmatprep.subr.bf16.mxu0 %v1448_v0  ;;  %1106 = vmatprep.subr.bf16.mxu1 %v1448_v0  ;;  %v1262_v50 = vld [vmem:[#allocation7] sm:$0xff]   ;;  %v1264_v52 = vld [vmem:[#allocation9 + $0x30] sm:$0xff]   ;;  %v1265_v53 = vld [vmem:[#allocation9 + $0x28] sm:$0xff]  }
  0x61   :  { %v1266_v54 = vld [vmem:[#allocation9 + $0x20] sm:$0xff]   ;;  %v1267_v55 = vld [vmem:[#allocation9 + $0x18] sm:$0xff]   ;;  %v1268_v56 = vld [vmem:[#allocation9 + $0x10] sm:$0xff]  }
  0x62   :  { %v972_v57 = vld [vmem:[%s1683_s6] ss:$0 sm:$0xff]  ;;  %v1269_v2 = vld [vmem:[#allocation9 + $0x8] sm:$0xff]   ;;  %v1271_v4 = vld [vmem:[#allocation10 + $0x38] sm:$0xff]  }
  0x63   :  { %1087 = vmatpush3.bf16.msra.mxu0 %v1234_v5  ;;  %1107 = vmatpush3.bf16.msra.mxu1 %v1242_v10  ;;  %v1270_v3 = vld [vmem:[#allocation9] sm:$0xff]   ;;  %v1272_v5 = vld [vmem:[#allocation10 + $0x30] sm:$0xff]   ;;  %v1273_v6 = vld [vmem:[#allocation10 + $0x28] sm:$0xff]  }
  0x64   :  { %1088 = vmatprep.subr.bf16.mxu0 %v1448_v0  ;;  %1108 = vmatprep.subr.bf16.mxu1 %v1448_v0  ;;  %v1275_v8 = vld [vmem:[#allocation10 + $0x18] sm:$0xff]   ;;  %v981_v10 = vld [vmem:[%s1685_s8] ss:$0 sm:$0xff] }
  0x67   :  { %1089 = vmatpush3.bf16.msra.mxu0 %v1235_v7  ;;  %1109 = vmatpush3.bf16.msra.mxu1 %v1243_v12  ;;  %v1274_v7 = vld [vmem:[#allocation10 + $0x20] sm:$0xff]  }
  0x68   :  { %1090 = vmatprep.subr.bf16.mxu0 %v1448_v0  ;;  %1110 = vmatprep.subr.bf16.mxu1 %v1448_v0 }
  0x6b   :  { %1091 = vmatpush3.bf16.msra.mxu0 %v1236_v9  ;;  %1111 = vmatpush3.bf16.msra.mxu1 %v1244_v15  ;;  %v1276_v9 = vld [vmem:[#allocation10 + $0x10] sm:$0xff]  }
  0x6c   :  { %1092 = vmatprep.subr.bf16.mxu0 %v1448_v0  ;;  %1112 = vmatprep.subr.bf16.mxu1 %v1448_v0 }
  0x6f   :  { %1093 = vmatpush3.bf16.msra.mxu0 %v1237_v11  ;;  %1113 = vmatpush3.bf16.msra.mxu1 %v1245_v17 }
  0x70   :  { %1094 = vmatprep.subr.bf16.mxu0 %v1448_v0  ;;  %1114 = vmatprep.subr.bf16.mxu1 %v1448_v0 }
  0x73   :  { %1095 = vmatpush3.bf16.msra.mxu0 %v1238_v13  ;;  %1115 = vmatpush3.bf16.msra.mxu1 %v1246_v18  ;;  %v1277_v18 = vld [vmem:[#allocation10 + $0x8] sm:$0xff]  }
  0x74   :  { %1120 = vmatprep.subr.bf16.mxu0 %v1448_v0  ;;  %1140 = vmatprep.subr.bf16.mxu1 %v1448_v0 }
  0x76   :  { %1097 = vmatmul.mubr.bf16.vlgmr.msra.gmra.mxu0 %v147_v16 }
  0x77   :  { %1136 = vmatprep.mubr.msk.bf16.mxu0 %vm1449_vm0, %v1448_v0  ;;  %1121 = vmatpush3.bf16.msra.mxu0 %v1247_v19  ;;  %v1278_v19 = vld [vmem:[#allocation10] sm:$0xff]  }
  0x78   :  { %1122 = vmatprep.subr.bf16.mxu0 %v1448_v0 }
  0x7b   :  { %1123 = vmatpush3.bf16.msra.mxu0 %v1248_v20  ;;  %v990_v20 = vld [vmem:[%s1687_s10] ss:$0 sm:$0xff] }
  0x7c   :  { %1124 = vmatprep.subr.bf16.mxu0 %v1448_v0 }
  0x7f   :  { %1125 = vmatpush3.bf16.msra.mxu0 %v1249_v21 }
  0x80   :  { %1126 = vmatprep.subr.bf16.mxu0 %v1448_v0 }
  0x83   :  { %1127 = vmatpush3.bf16.msra.mxu0 %v1250_v22 }
  0x84   :  { %1128 = vmatprep.subr.bf16.mxu0 %v1448_v0 }
  0x87   :  { %1129 = vmatpush3.bf16.msra.mxu0 %v1251_v23 }
  0x88   :  { %1130 = vmatprep.subr.bf16.mxu0 %v1448_v0 }
  0x8b   :  { %1131 = vmatpush3.bf16.msra.mxu0 %v1252_v24 }
  0x8c   :  { %1132 = vmatprep.subr.bf16.mxu0 %v1448_v0 }
  0x8f   :  { %1133 = vmatpush3.bf16.msra.mxu0 %v1253_v33  ;;  %v1284_v33 = vld [vmem:[#allocation12 + $0x10] sm:$0xff]  }
  0x90   :  { %1134 = vmatprep.subr.bf16.mxu0 %v1448_v0 }
  0x93   :  { %1135 = vmatpush3.bf16.msra.mxu0 %v1254_v34  ;;  %v1285_v34 = vld [vmem:[#allocation12 + $0x8] sm:$0xff]  }
  0x94   :  { %1160 = vmatprep.subr.bf16.mxu0 %v1448_v0 }
 0x136   :  { %v253_v26 = vpop.f32.mrf.mxu0 }
 0x137   :  { %v254_v27 = vadd.f32 %v954_v25, %v253_v26 }
 0x138   :  { %v1098_v28 = vpop.f32.mrf.mxu0 }
 0x139   :  { %v259_v29 = vmax.f32 %v254_v27, 0.0  ;;  %v1279_v28 = vld [vmem:[#allocation12 + $0x38] sm:$0xff]  }
 0x13a   :  { %v256_v30 = vpop.f32.mrf.mxu0 }
 0x13b   :  { %v260_v31 = vpack.c.bf16 %v259_v29, %v259_v29  ;;  %v1280_v29 = vld [vmem:[#allocation12 + $0x30] sm:$0xff]   ;;  %v1281_v30 = vld [vmem:[#allocation12 + $0x28] sm:$0xff]  }
 0x13c   :  { %v1099_v32 = vpop.f32.mrf.mxu0 }
 0x13d   :  { %1117 = vmatmul.mubr.bf16.vlgmr.msra.gmra.mxu1 %v260_v31  ;;  %v1282_v31 = vld [vmem:[#allocation12 + $0x20] sm:$0xff]   ;;  %v1283_v32 = vld [vmem:[#allocation12 + $0x18] sm:$0xff]  }
 0x13e   :  { %1156 = vmatprep.mubr.msk.bf16.mxu1 %vm1449_vm0, %v1448_v0  ;;  %1141 = vmatpush3.bf16.msra.mxu1 %v1255_v35  ;;  %v1286_v35 = vld [vmem:[#allocation12] sm:$0xff]  }
 0x13f   :  { %1142 = vmatprep.subr.bf16.mxu1 %v1448_v0 }
 0x142   :  { %1143 = vmatpush3.bf16.msra.mxu1 %v1256_v36  ;;  %v999_v36 = vld [vmem:[%s1689_s12] ss:$0 sm:$0xff] }
 0x143   :  { %1144 = vmatprep.subr.bf16.mxu1 %v1448_v0 }
 0x146   :  { %1145 = vmatpush3.bf16.msra.mxu1 %v1257_v37 }
 0x147   :  { %1146 = vmatprep.subr.bf16.mxu1 %v1448_v0 }
 0x14a   :  { %1147 = vmatpush3.bf16.msra.mxu1 %v1258_v38 }
 0x14b   :  { %1148 = vmatprep.subr.bf16.mxu1 %v1448_v0 }
 0x14e   :  { %1149 = vmatpush3.bf16.msra.mxu1 %v1259_v39 }
 0x14f   :  { %1150 = vmatprep.subr.bf16.mxu1 %v1448_v0 }
 0x152   :  { %1151 = vmatpush3.bf16.msra.mxu1 %v1260_v40 }
 0x153   :  { %1152 = vmatprep.subr.bf16.mxu1 %v1448_v0 }
 0x156   :  { %1153 = vmatpush3.bf16.msra.mxu1 %v1261_v49 }
 0x157   :  { %1154 = vmatprep.subr.bf16.mxu1 %v1448_v0 }
 0x15a   :  { %1155 = vmatpush3.bf16.msra.mxu1 %v1262_v50 }
 0x15b   :  { %1180 = vmatprep.subr.bf16.mxu1 %v1448_v0 }
 0x1fd   :  { %v366_v42 = vpop.f32.mrf.mxu1 }
 0x1fe   :  { %v367_v43 = vadd.f32 %v963_v41, %v366_v42 }
 0x1ff   :  { %v1118_v44 = vpop.f32.mrf.mxu1 }
 0x200   :  { %v372_v45 = vmax.f32 %v367_v43, 0.0 }
 0x201   :  { %v369_v46 = vpop.f32.mrf.mxu1 }
 0x202   :  { %v373_v47 = vpack.c.bf16 %v372_v45, %v372_v45 }
 0x203   :  { %v1119_v48 = vpop.f32.mrf.mxu1 }
 0x204   :  { %1137 = vmatmul.mubr.bf16.vlgmr.msra.gmra.mxu0 %v373_v47 }
 0x205   :  { %1176 = vmatprep.mubr.msk.bf16.mxu0 %vm1449_vm0, %v1448_v0  ;;  %1161 = vmatpush3.bf16.msra.mxu0 %v1263_v51 }
 0x206   :  { %1162 = vmatprep.subr.bf16.mxu0 %v1448_v0 }
 0x209   :  { %1163 = vmatpush3.bf16.msra.mxu0 %v1264_v52 }
 0x20a   :  { %1164 = vmatprep.subr.bf16.mxu0 %v1448_v0 }
 0x20d   :  { %1165 = vmatpush3.bf16.msra.mxu0 %v1265_v53 }
 0x20e   :  { %1166 = vmatprep.subr.bf16.mxu0 %v1448_v0 }
 0x211   :  { %1167 = vmatpush3.bf16.msra.mxu0 %v1266_v54 }
 0x212   :  { %1168 = vmatprep.subr.bf16.mxu0 %v1448_v0 }
 0x215   :  { %1169 = vmatpush3.bf16.msra.mxu0 %v1267_v55 }
 0x216   :  { %1170 = vmatprep.subr.bf16.mxu0 %v1448_v0 }
 0x219   :  { %1171 = vmatpush3.bf16.msra.mxu0 %v1268_v56 }
 0x21a   :  { %1172 = vmatprep.subr.bf16.mxu0 %v1448_v0 }
 0x21d   :  { %1173 = vmatpush3.bf16.msra.mxu0 %v1269_v2 }
 0x21e   :  { %1174 = vmatprep.subr.bf16.mxu0 %v1448_v0 }
 0x221   :  { %1175 = vmatpush3.bf16.msra.mxu0 %v1270_v3 }
 0x222   :  { %1200 = vmatprep.subr.bf16.mxu0 %v1448_v0 }
 0x2c4   :  { %v479_v58 = vpop.f32.mrf.mxu0 }
 0x2c5   :  { %v480_v59 = vadd.f32 %v972_v57, %v479_v58 }
 0x2c6   :  { %v1138_v60 = vpop.f32.mrf.mxu0 }
 0x2c7   :  { %v485_v61 = vmax.f32 %v480_v59, 0.0 }
 0x2c8   :  { %v482_v62 = vpop.f32.mrf.mxu0 }
 0x2c9   :  { %v486_v63 = vpack.c.bf16 %v485_v61, %v485_v61 }
 0x2ca   :  { %v1139_v1 = vpop.f32.mrf.mxu0 }
 0x2cb   :  { %1157 = vmatmul.mubr.bf16.vlgmr.msra.gmra.mxu1 %v486_v63 }
 0x2cc   :  { %1196 = vmatprep.mubr.msk.bf16.mxu1 %vm1449_vm0, %v1448_v0  ;;  %1181 = vmatpush3.bf16.msra.mxu1 %v1271_v4 }
 0x2cd   :  { %1182 = vmatprep.subr.bf16.mxu1 %v1448_v0 }
 0x2d0   :  { %1183 = vmatpush3.bf16.msra.mxu1 %v1272_v5 }
 0x2d1   :  { %1184 = vmatprep.subr.bf16.mxu1 %v1448_v0 }
 0x2d4   :  { %1185 = vmatpush3.bf16.msra.mxu1 %v1273_v6 }
 0x2d5   :  { %1186 = vmatprep.subr.bf16.mxu1 %v1448_v0 }
 0x2d8   :  { %1187 = vmatpush3.bf16.msra.mxu1 %v1274_v7 }
 0x2d9   :  { %1188 = vmatprep.subr.bf16.mxu1 %v1448_v0 }
 0x2dc   :  { %1189 = vmatpush3.bf16.msra.mxu1 %v1275_v8 }
 0x2dd   :  { %1190 = vmatprep.subr.bf16.mxu1 %v1448_v0 }
 0x2e0   :  { %1191 = vmatpush3.bf16.msra.mxu1 %v1276_v9 }
 0x2e1   :  { %1192 = vmatprep.subr.bf16.mxu1 %v1448_v0 }
 0x2e4   :  { %1193 = vmatpush3.bf16.msra.mxu1 %v1277_v18 }
 0x2e5   :  { %1194 = vmatprep.subr.bf16.mxu1 %v1448_v0 }
 0x2e8   :  { %1195 = vmatpush3.bf16.msra.mxu1 %v1278_v19 }
 0x38b   :  { %v592_v11 = vpop.f32.mrf.mxu1 }
 0x38c   :  { %v593_v12 = vadd.f32 %v981_v10, %v592_v11 }
 0x38d   :  { %v1158_v13 = vpop.f32.mrf.mxu1 }
 0x38e   :  { %v598_v14 = vmax.f32 %v593_v12, 0.0 }
 0x38f   :  { %v595_v15 = vpop.f32.mrf.mxu1 }
 0x390   :  { %v599_v16 = vpack.c.bf16 %v598_v14, %v598_v14 }
 0x391   :  { %v1159_v17 = vpop.f32.mrf.mxu1 }
 0x392   :  { %1177 = vmatmul.mubr.bf16.vlgmr.msra.gmra.mxu0 %v599_v16 }
 0x393   :  { %1216 = vmatprep.mubr.msk.bf16.mxu0 %vm1449_vm0, %v1448_v0  ;;  %1201 = vmatpush3.bf16.msra.mxu0 %v1279_v28 }
 0x394   :  { %1202 = vmatprep.subr.bf16.mxu0 %v1448_v0 }
 0x397   :  { %1203 = vmatpush3.bf16.msra.mxu0 %v1280_v29 }
 0x398   :  { %1204 = vmatprep.subr.bf16.mxu0 %v1448_v0 }
 0x39b   :  { %1205 = vmatpush3.bf16.msra.mxu0 %v1281_v30 }
 0x39c   :  { %1206 = vmatprep.subr.bf16.mxu0 %v1448_v0 }
 0x39f   :  { %1207 = vmatpush3.bf16.msra.mxu0 %v1282_v31 }
 0x3a0   :  { %1208 = vmatprep.subr.bf16.mxu0 %v1448_v0 }
 0x3a3   :  { %1209 = vmatpush3.bf16.msra.mxu0 %v1283_v32 }
 0x3a4   :  { %1210 = vmatprep.subr.bf16.mxu0 %v1448_v0 }
 0x3a7   :  { %1211 = vmatpush3.bf16.msra.mxu0 %v1284_v33 }
 0x3a8   :  { %1212 = vmatprep.subr.bf16.mxu0 %v1448_v0 }
 0x3ab   :  { %1213 = vmatpush3.bf16.msra.mxu0 %v1285_v34 }
 0x3ac   :  { %1214 = vmatprep.subr.bf16.mxu0 %v1448_v0 }
 0x3af   :  { %1215 = vmatpush3.bf16.msra.mxu0 %v1286_v35 }
 0x452   :  { %v705_v21 = vpop.f32.mrf.mxu0 }
 0x453   :  { %v706_v22 = vadd.f32 %v990_v20, %v705_v21 }
 0x454   :  { %v1178_v23 = vpop.f32.mrf.mxu0 }
 0x455   :  { %711 = vst [vmem:[%s1691_s14] sm:$0xff] %v706_v22  ;;  %v712_v24 = vmax.f32 %v706_v22, 0.0 }
 0x456   :  { %v708_v25 = vpop.f32.mrf.mxu0 }
 0x457   :  { %v713_v26 = vpack.c.bf16 %v712_v24, %v712_v24 }
 0x458   :  { %v1179_v27 = vpop.f32.mrf.mxu0 }
 0x459   :  { %1197 = vmatmul.mubr.bf16.vlgmr.msra.gmra.mxu1 %v713_v26 }
 0x519   :  { %v819_v37 = vpop.f32.mrf.mxu1 }
 0x51a   :  { %v820_v38 = vadd.f32 %v999_v36, %v819_v37 }
 0x51b   :  { %v1198_v39 = vpop.f32.mrf.mxu1 }
 0x51c   :  { %825 = vst [vmem:[%s1692_s15] sm:$0xff] %v820_v38  ;;  %v1008_v40 = vmul.f32 -1.442695, %v820_v38 }
 0x51d   :  { %v822_v41 = vpop.f32.mrf.mxu1 }
 0x51e   :  { %1287 = vpow2.f32 %v1008_v40 }
 0x51f   :  { %v1199_v42 = vpop.f32.mrf.mxu1 }
 0x52b   :  { %v1288_v43 = vpop.eup %1287 }
 0x52c   :  { %v829_v44 = vadd.f32 1.0, %v1288_v43 }
 0x52e   :  { %1289 = vrcp.f32 %v829_v44 }
 0x53b   :  { %v1290_v0 = vpop.eup %1289 }
 0x53c   :  { %v832_v45 = vpack.c.bf16 %v1290_v0, %v1290_v0 }
 0x53e   :  { %1217 = vmatmul.mubr.bf16.vlgmr.msra.gmra.mxu0 %v832_v45 }
 0x5fe   :  { %v931_v46 = vpop.f32.mrf.mxu0 }
 0x5ff   :  { %937 = vst [vmem:[%s1693_s16] sm:$0xff] %v931_v46 }
 0x600   :  { %v1218_v47 = vpop.f32.mrf.mxu0 }
 0x602   :  { %v934_v48 = vpop.f32.mrf.mxu0 }
 0x604   :  { %v1219_v49 = vpop.f32.mrf.mxu0 }
 0x605   :  { %950 = vsyncpa [#allocation3], 1 }
 0x606   :  { %951 = vsyncpa [#allocation5], 1 }
 0x607   :  { %952 = vsyncpa [#allocation8], 1 }
 0x608   :  { %953 = vsyncpa [#allocation11], 1 }

</bundles_post_ra>
